<compile_context>
chip_gen: v7x
topology: tpu7x:2x2x1
jax: 0.10.0
libtpu: 0.0.40
codegen_flags: <defaults>
</compile_context>

<pallas_src>
import jax
import jax.numpy as jnp
from jax import lax
from jax.experimental import pallas as pl
from jax.experimental.pallas import tpu as pltpu


def _round_up(v, m):
    return -(-v // m) * m


def _make_kernel(n_obs):
    """Kernel: per-observation MLP in transposed (feature, task-lane) layout,
    f32 sum over observations, scale by 1/N at the end."""

    def kernel(xy_ref, *refs):
        out_ref = refs[-1]
        prefs = refs[:-1]                       # alternating W^T, b
        num_layers = len(prefs) // 2
        Ws = [prefs[2 * i][...] for i in range(num_layers)]        # (d_out, d_in)
        Bs = [prefs[2 * i + 1][...] for i in range(num_layers)]    # (d_out, 1)

        def obs_step(n, acc):
            h = xy_ref[n]                       # (D_pad, tb) f32
            for li in range(num_layers):
                h = jnp.dot(Ws[li], h, preferred_element_type=jnp.float32) + Bs[li]
                if li < num_layers - 1:
                    h = jnp.maximum(h, 0.0)     # f32 elementwise (v5e-safe)
            return acc + h                      # (num_latents, tb) f32

        acc = jnp.zeros(out_ref.shape, jnp.float32)
        if n_obs <= 16:
            for n in range(n_obs):              # small N: full unroll
                acc = obs_step(n, acc)
        else:
            acc = lax.fori_loop(0, n_obs, obs_step, acc)

        out_ref[...] = (acc * (1.0 / n_obs)).astype(out_ref.dtype)

    return kernel


def _choose_tb(batch, n_obs, target_rows=4096):
    """Tasks per grid block.  Target ~4096 MLP rows per block so the ~0.35us
    per-step grid overhead is amortised, keep the lane (task) dim a multiple
    of 128 for lane-dense blocks/stores, and keep >= 2 blocks whenever the
    batch allows it so v7x can shard the parallel axis over both TensorCores."""
    if batch <= 128:
        return batch                            # single block == full array: legal
    tb = _round_up(-(-target_rows // max(n_obs, 1)), 128)
    half = _round_up(-(-batch // 2), 128)       # guarantees >= 2 grid blocks
    return max(128, min(tb, half))


def deterministic_encoder_forward(context_x, context_y, params, *, tb=None):
    """
    Args:
      context_x: [B, N, x_dim] float32
      context_y: [B, N, y_dim] float32
      params: list of (W, b); hidden layers first, last projection last.
              W_i: [d_in, d_out], b_i: [d_out]
      tb: optional override of tasks-per-block (must be a multiple of 128 if
          it results in more than one grid block).
    Returns:
      rep: [B, num_latents] float32
    """
    B, N, x_dim = context_x.shape
    By, Ny, y_dim = context_y.shape
    assert (B, N) == (By, Ny)
    D = x_dim + y_dim
    num_latents = params[-1][0].shape[1]

    if tb is None:
        tb = _choose_tb(B, N)
    grid_b = -(-B // tb)
    assert grid_b == 1 or tb % 128 == 0, (
        "tasks-per-block must be a multiple of 128 when more than one grid "
        "block is used (TPU lane-tiling rule)")
    B_pad = grid_b * tb

    # Fuse torch.cat in the wrapper; lay the input out obs-major with the task
    # axis on lanes: (N, D_pad, B_pad) f32.  The tiny feature dim is
    # zero-padded to (a multiple of) 8 so layer 0 has an aligned contraction.
    D_pad = _round_up(max(D, 8), 8)
    enc = jnp.concatenate([context_x, context_y], axis=-1).astype(jnp.float32)
    enc = jnp.pad(enc, ((0, B_pad - B), (0, 0), (0, D_pad - D)))
    xy = jnp.transpose(enc, (1, 2, 0))                       # (N, D_pad, B_pad)

    # Transposed f32 weights (d_out, d_in) + f32 biases (d_out, 1); layer 0's
    # d_in zero-padded to D_pad.  Passed as whole-array, resident blocks.
    flat_params = []
    for li, (W, b) in enumerate(params):
        Wt = jnp.asarray(W, jnp.float32).T
        if li == 0:
            Wt = jnp.pad(Wt, ((0, 0), (0, D_pad - D)))
        flat_params.append(Wt)
        flat_params.append(jnp.asarray(b, jnp.float32).reshape(-1, 1))

    in_specs = [pl.BlockSpec((N, D_pad, tb), lambda i: (0, 0, i))]
    in_specs += [pl.BlockSpec(p.shape, lambda i: (0, 0)) for p in flat_params]

    out_t = pl.pallas_call(
        _make_kernel(N),
        out_shape=jax.ShapeDtypeStruct((num_latents, B_pad), jnp.float32),
        grid=(grid_b,),
        in_specs=in_specs,
        out_specs=pl.BlockSpec((num_latents, tb), lambda i: (0, i)),
        compiler_params=pltpu.CompilerParams(
            dimension_semantics=("parallel",)),
    )(xy, *flat_params)

    return out_t[:, :B].T                                    # (B, num_latents)


def init_params(key, input_dim, layer_sizes, num_latents):
    """Deterministic parameter init mirroring nn.Linear shapes."""
    params = []
    dims = [input_dim] + list(layer_sizes) + [num_latents]
    for i in range(len(dims) - 1):
        key, kw, kb = jax.random.split(key, 3)
        bound = 1.0 / jnp.sqrt(dims[i])
        W = jax.random.uniform(kw, (dims[i], dims[i + 1]), jnp.float32,
                               minval=-bound, maxval=bound)
        b = jax.random.uniform(kb, (dims[i + 1],), jnp.float32,
                               minval=-bound, maxval=bound)
        params.append((W, b))
    return params


def reference_forward(context_x, context_y, params):
    """Pure f32 JAX reference matching the PyTorch forward."""
    enc = jnp.concatenate([context_x, context_y], axis=-1)
    B, N, D = enc.shape
    h = enc.reshape(-1, D)
    for W, b in params[:-1]:
        h = jnp.maximum(jnp.dot(h, W, precision=lax.Precision.HIGHEST) + b, 0.0)
    W, b = params[-1]
    h = jnp.dot(h, W, precision=lax.Precision.HIGHEST) + b
    return h.reshape(B, N, -1).mean(axis=1)


if __name__ == "__main__":
    # Shapes consistent with the module: B tasks, N observations,
    # x_dim=3, y_dim=1, hidden layer_sizes=[32, 32], num_latents=16.
    B, N, x_dim, y_dim = 2, 8, 3, 1
    layer_sizes = [32, 32]
    num_latents = 16
    input_dim = x_dim + y_dim

    key = jax.random.PRNGKey(0)
    key, kx, ky, kp = jax.random.split(key, 4)
    context_x = jax.random.normal(kx, (B, N, x_dim), jnp.float32)
    context_y = jax.random.normal(ky, (B, N, y_dim), jnp.float32)
    params = init_params(kp, input_dim, layer_sizes, num_latents)

    rep = jax.block_until_ready(
        deterministic_encoder_forward(context_x, context_y, params))
    assert rep.shape == (B, num_latents), rep.shape
    ref = reference_forward(context_x, context_y, params)
    assert jnp.allclose(rep, ref, atol=1e-3, rtol=1e-3), (
        float(jnp.max(jnp.abs(rep - ref))))

    # Multi-block path: batch > 128 -> lane-dense blocks (tb multiple of 128),
    # >= 2 grid blocks (v7x megacore), batch padding sliced off.
    B2 = 300
    key, kx2, ky2 = jax.random.split(key, 3)
    cx2 = jax.random.normal(kx2, (B2, N, x_dim), jnp.float32)
    cy2 = jax.random.normal(ky2, (B2, N, y_dim), jnp.float32)
    rep2 = jax.block_until_ready(
        deterministic_encoder_forward(cx2, cy2, params))
    assert rep2.shape == (B2, num_latents), rep2.shape
    ref2 = reference_forward(cx2, cy2, params)
    assert jnp.allclose(rep2, ref2, atol=1e-3, rtol=1e-3), (
        float(jnp.max(jnp.abs(rep2 - ref2))))

    print("KERNEL_OK")
</pallas_src>

<mosaic_0001>
module attributes {stable_mosaic.version = 11 : i64} {
  func.func @kernel(%arg0: i32, %arg1: memref<8x8x2xf32, #tpu.memory_space<vmem>>, %arg2: memref<32x8xf32, #tpu.memory_space<vmem>>, %arg3: memref<32x1xf32, #tpu.memory_space<vmem>>, %arg4: memref<32x32xf32, #tpu.memory_space<vmem>>, %arg5: memref<32x1xf32, #tpu.memory_space<vmem>>, %arg6: memref<16x32xf32, #tpu.memory_space<vmem>>, %arg7: memref<16x1xf32, #tpu.memory_space<vmem>>, %arg8: memref<16x2xf32, #tpu.memory_space<vmem>>) attributes {dimension_semantics = [#tpu.dimension_semantics<parallel>], iteration_bounds = array<i64: 1>, scalar_prefetch = 0 : i64, scratch_operands = 0 : i64, tpu.core_type = #tpu.core_type<tc>, window_params = [{transform_indices = @transform_0, window_bounds = array<i64: 8, 8, 2>}, {pipeline_mode = #tpu.pipeline_mode<synchronous>, transform_indices = @transform_1, window_bounds = array<i64: 32, 8>}, {pipeline_mode = #tpu.pipeline_mode<synchronous>, transform_indices = @transform_2, window_bounds = array<i64: 32, 1>}, {pipeline_mode = #tpu.pipeline_mode<synchronous>, transform_indices = @transform_3, window_bounds = array<i64: 32, 32>}, {pipeline_mode = #tpu.pipeline_mode<synchronous>, transform_indices = @transform_4, window_bounds = array<i64: 32, 1>}, {pipeline_mode = #tpu.pipeline_mode<synchronous>, transform_indices = @transform_5, window_bounds = array<i64: 16, 32>}, {pipeline_mode = #tpu.pipeline_mode<synchronous>, transform_indices = @transform_6, window_bounds = array<i64: 16, 1>}, {transform_indices = @transform_7, window_bounds = array<i64: 16, 2>}]} {
    %c0 = arith.constant 0 : index
    %c0_0 = arith.constant 0 : index
    %0 = vector.load %arg2[%c0, %c0_0] : memref<32x8xf32, #tpu.memory_space<vmem>>, vector<32x8xf32>
    %c0_1 = arith.constant 0 : index
    %c0_2 = arith.constant 0 : index
    %1 = vector.load %arg4[%c0_1, %c0_2] : memref<32x32xf32, #tpu.memory_space<vmem>>, vector<32x32xf32>
    %c0_3 = arith.constant 0 : index
    %c0_4 = arith.constant 0 : index
    %2 = vector.load %arg6[%c0_3, %c0_4] : memref<16x32xf32, #tpu.memory_space<vmem>>, vector<16x32xf32>
    %c0_5 = arith.constant 0 : index
    %c0_6 = arith.constant 0 : index
    %3 = vector.load %arg3[%c0_5, %c0_6] : memref<32x1xf32, #tpu.memory_space<vmem>>, vector<32x1xf32>
    %c0_7 = arith.constant 0 : index
    %c0_8 = arith.constant 0 : index
    %4 = vector.load %arg5[%c0_7, %c0_8] : memref<32x1xf32, #tpu.memory_space<vmem>>, vector<32x1xf32>
    %c0_9 = arith.constant 0 : index
    %c0_10 = arith.constant 0 : index
    %5 = vector.load %arg7[%c0_9, %c0_10] : memref<16x1xf32, #tpu.memory_space<vmem>>, vector<16x1xf32>
    %cst = arith.constant 0.000000e+00 : f32
    %6 = vector.broadcast %cst : f32 to vector<16x2xf32>
    %c0_11 = arith.constant 0 : index
    %c0_12 = arith.constant 0 : index
    %c0_13 = arith.constant 0 : index
    %7 = vector.load %arg1[%c0_11, %c0_12, %c0_13] : memref<8x8x2xf32, #tpu.memory_space<vmem>>, vector<1x8x2xf32>
    %8 = vector.shape_cast %7 : vector<1x8x2xf32> to vector<8x2xf32>
    %cst_14 = arith.constant dense<0.000000e+00> : vector<32x2xf32>
    %9 = tpu.matmul %0, %8, %cst_14 {dimension_numbers = #tpu.dot_dimension_numbers<[1], [0], [0], [1], [0, 0, 1, 1], [], []>} : vector<32x8xf32>, vector<8x2xf32>, vector<32x2xf32> -> vector<32x2xf32>
    %10 = vector.broadcast %3 : vector<32x1xf32> to vector<32x2xf32>
    %11 = arith.addf %9, %10 : vector<32x2xf32>
    %cst_15 = arith.constant 0.000000e+00 : f32
    %12 = vector.broadcast %cst_15 : f32 to vector<32x2xf32>
    %13 = arith.maximumf %11, %12 : vector<32x2xf32>
    %cst_16 = arith.constant dense<0.000000e+00> : vector<32x2xf32>
    %14 = tpu.matmul %1, %13, %cst_16 {dimension_numbers = #tpu.dot_dimension_numbers<[1], [0], [0], [1], [0, 0, 1, 1], [], []>} : vector<32x32xf32>, vector<32x2xf32>, vector<32x2xf32> -> vector<32x2xf32>
    %15 = vector.broadcast %4 : vector<32x1xf32> to vector<32x2xf32>
    %16 = arith.addf %14, %15 : vector<32x2xf32>
    %cst_17 = arith.constant 0.000000e+00 : f32
    %17 = vector.broadcast %cst_17 : f32 to vector<32x2xf32>
    %18 = arith.maximumf %16, %17 : vector<32x2xf32>
    %cst_18 = arith.constant dense<0.000000e+00> : vector<16x2xf32>
    %19 = tpu.matmul %2, %18, %cst_18 {dimension_numbers = #tpu.dot_dimension_numbers<[1], [0], [0], [1], [0, 0, 1, 1], [], []>} : vector<16x32xf32>, vector<32x2xf32>, vector<16x2xf32> -> vector<16x2xf32>
    %20 = vector.broadcast %5 : vector<16x1xf32> to vector<16x2xf32>
    %21 = arith.addf %19, %20 : vector<16x2xf32>
    %22 = arith.addf %6, %21 : vector<16x2xf32>
    %c1 = arith.constant 1 : index
    %c0_19 = arith.constant 0 : index
    %c0_20 = arith.constant 0 : index
    %23 = vector.load %arg1[%c1, %c0_19, %c0_20] : memref<8x8x2xf32, #tpu.memory_space<vmem>>, vector<1x8x2xf32>
    %24 = vector.shape_cast %23 : vector<1x8x2xf32> to vector<8x2xf32>
    %cst_21 = arith.constant dense<0.000000e+00> : vector<32x2xf32>
    %25 = tpu.matmul %0, %24, %cst_21 {dimension_numbers = #tpu.dot_dimension_numbers<[1], [0], [0], [1], [0, 0, 1, 1], [], []>} : vector<32x8xf32>, vector<8x2xf32>, vector<32x2xf32> -> vector<32x2xf32>
    %26 = vector.broadcast %3 : vector<32x1xf32> to vector<32x2xf32>
    %27 = arith.addf %25, %26 : vector<32x2xf32>
    %cst_22 = arith.constant 0.000000e+00 : f32
    %28 = vector.broadcast %cst_22 : f32 to vector<32x2xf32>
    %29 = arith.maximumf %27, %28 : vector<32x2xf32>
    %cst_23 = arith.constant dense<0.000000e+00> : vector<32x2xf32>
    %30 = tpu.matmul %1, %29, %cst_23 {dimension_numbers = #tpu.dot_dimension_numbers<[1], [0], [0], [1], [0, 0, 1, 1], [], []>} : vector<32x32xf32>, vector<32x2xf32>, vector<32x2xf32> -> vector<32x2xf32>
    %31 = vector.broadcast %4 : vector<32x1xf32> to vector<32x2xf32>
    %32 = arith.addf %30, %31 : vector<32x2xf32>
    %cst_24 = arith.constant 0.000000e+00 : f32
    %33 = vector.broadcast %cst_24 : f32 to vector<32x2xf32>
    %34 = arith.maximumf %32, %33 : vector<32x2xf32>
    %cst_25 = arith.constant dense<0.000000e+00> : vector<16x2xf32>
    %35 = tpu.matmul %2, %34, %cst_25 {dimension_numbers = #tpu.dot_dimension_numbers<[1], [0], [0], [1], [0, 0, 1, 1], [], []>} : vector<16x32xf32>, vector<32x2xf32>, vector<16x2xf32> -> vector<16x2xf32>
    %36 = vector.broadcast %5 : vector<16x1xf32> to vector<16x2xf32>
    %37 = arith.addf %35, %36 : vector<16x2xf32>
    %38 = arith.addf %22, %37 : vector<16x2xf32>
    %c2 = arith.constant 2 : index
    %c0_26 = arith.constant 0 : index
    %c0_27 = arith.constant 0 : index
    %39 = vector.load %arg1[%c2, %c0_26, %c0_27] : memref<8x8x2xf32, #tpu.memory_space<vmem>>, vector<1x8x2xf32>
    %40 = vector.shape_cast %39 : vector<1x8x2xf32> to vector<8x2xf32>
    %cst_28 = arith.constant dense<0.000000e+00> : vector<32x2xf32>
    %41 = tpu.matmul %0, %40, %cst_28 {dimension_numbers = #tpu.dot_dimension_numbers<[1], [0], [0], [1], [0, 0, 1, 1], [], []>} : vector<32x8xf32>, vector<8x2xf32>, vector<32x2xf32> -> vector<32x2xf32>
    %42 = vector.broadcast %3 : vector<32x1xf32> to vector<32x2xf32>
    %43 = arith.addf %41, %42 : vector<32x2xf32>
    %cst_29 = arith.constant 0.000000e+00 : f32
    %44 = vector.broadcast %cst_29 : f32 to vector<32x2xf32>
    %45 = arith.maximumf %43, %44 : vector<32x2xf32>
    %cst_30 = arith.constant dense<0.000000e+00> : vector<32x2xf32>
    %46 = tpu.matmul %1, %45, %cst_30 {dimension_numbers = #tpu.dot_dimension_numbers<[1], [0], [0], [1], [0, 0, 1, 1], [], []>} : vector<32x32xf32>, vector<32x2xf32>, vector<32x2xf32> -> vector<32x2xf32>
    %47 = vector.broadcast %4 : vector<32x1xf32> to vector<32x2xf32>
    %48 = arith.addf %46, %47 : vector<32x2xf32>
    %cst_31 = arith.constant 0.000000e+00 : f32
    %49 = vector.broadcast %cst_31 : f32 to vector<32x2xf32>
    %50 = arith.maximumf %48, %49 : vector<32x2xf32>
    %cst_32 = arith.constant dense<0.000000e+00> : vector<16x2xf32>
    %51 = tpu.matmul %2, %50, %cst_32 {dimension_numbers = #tpu.dot_dimension_numbers<[1], [0], [0], [1], [0, 0, 1, 1], [], []>} : vector<16x32xf32>, vector<32x2xf32>, vector<16x2xf32> -> vector<16x2xf32>
    %52 = vector.broadcast %5 : vector<16x1xf32> to vector<16x2xf32>
    %53 = arith.addf %51, %52 : vector<16x2xf32>
    %54 = arith.addf %38, %53 : vector<16x2xf32>
    %c3 = arith.constant 3 : index
    %c0_33 = arith.constant 0 : index
    %c0_34 = arith.constant 0 : index
    %55 = vector.load %arg1[%c3, %c0_33, %c0_34] : memref<8x8x2xf32, #tpu.memory_space<vmem>>, vector<1x8x2xf32>
    %56 = vector.shape_cast %55 : vector<1x8x2xf32> to vector<8x2xf32>
    %cst_35 = arith.constant dense<0.000000e+00> : vector<32x2xf32>
    %57 = tpu.matmul %0, %56, %cst_35 {dimension_numbers = #tpu.dot_dimension_numbers<[1], [0], [0], [1], [0, 0, 1, 1], [], []>} : vector<32x8xf32>, vector<8x2xf32>, vector<32x2xf32> -> vector<32x2xf32>
    %58 = vector.broadcast %3 : vector<32x1xf32> to vector<32x2xf32>
    %59 = arith.addf %57, %58 : vector<32x2xf32>
    %cst_36 = arith.constant 0.000000e+00 : f32
    %60 = vector.broadcast %cst_36 : f32 to vector<32x2xf32>
    %61 = arith.maximumf %59, %60 : vector<32x2xf32>
    %cst_37 = arith.constant dense<0.000000e+00> : vector<32x2xf32>
    %62 = tpu.matmul %1, %61, %cst_37 {dimension_numbers = #tpu.dot_dimension_numbers<[1], [0], [0], [1], [0, 0, 1, 1], [], []>} : vector<32x32xf32>, vector<32x2xf32>, vector<32x2xf32> -> vector<32x2xf32>
    %63 = vector.broadcast %4 : vector<32x1xf32> to vector<32x2xf32>
    %64 = arith.addf %62, %63 : vector<32x2xf32>
    %cst_38 = arith.constant 0.000000e+00 : f32
    %65 = vector.broadcast %cst_38 : f32 to vector<32x2xf32>
    %66 = arith.maximumf %64, %65 : vector<32x2xf32>
    %cst_39 = arith.constant dense<0.000000e+00> : vector<16x2xf32>
    %67 = tpu.matmul %2, %66, %cst_39 {dimension_numbers = #tpu.dot_dimension_numbers<[1], [0], [0], [1], [0, 0, 1, 1], [], []>} : vector<16x32xf32>, vector<32x2xf32>, vector<16x2xf32> -> vector<16x2xf32>
    %68 = vector.broadcast %5 : vector<16x1xf32> to vector<16x2xf32>
    %69 = arith.addf %67, %68 : vector<16x2xf32>
    %70 = arith.addf %54, %69 : vector<16x2xf32>
    %c4 = arith.constant 4 : index
    %c0_40 = arith.constant 0 : index
    %c0_41 = arith.constant 0 : index
    %71 = vector.load %arg1[%c4, %c0_40, %c0_41] : memref<8x8x2xf32, #tpu.memory_space<vmem>>, vector<1x8x2xf32>
    %72 = vector.shape_cast %71 : vector<1x8x2xf32> to vector<8x2xf32>
    %cst_42 = arith.constant dense<0.000000e+00> : vector<32x2xf32>
    %73 = tpu.matmul %0, %72, %cst_42 {dimension_numbers = #tpu.dot_dimension_numbers<[1], [0], [0], [1], [0, 0, 1, 1], [], []>} : vector<32x8xf32>, vector<8x2xf32>, vector<32x2xf32> -> vector<32x2xf32>
    %74 = vector.broadcast %3 : vector<32x1xf32> to vector<32x2xf32>
    %75 = arith.addf %73, %74 : vector<32x2xf32>
    %cst_43 = arith.constant 0.000000e+00 : f32
    %76 = vector.broadcast %cst_43 : f32 to vector<32x2xf32>
    %77 = arith.maximumf %75, %76 : vector<32x2xf32>
    %cst_44 = arith.constant dense<0.000000e+00> : vector<32x2xf32>
    %78 = tpu.matmul %1, %77, %cst_44 {dimension_numbers = #tpu.dot_dimension_numbers<[1], [0], [0], [1], [0, 0, 1, 1], [], []>} : vector<32x32xf32>, vector<32x2xf32>, vector<32x2xf32> -> vector<32x2xf32>
    %79 = vector.broadcast %4 : vector<32x1xf32> to vector<32x2xf32>
    %80 = arith.addf %78, %79 : vector<32x2xf32>
    %cst_45 = arith.constant 0.000000e+00 : f32
    %81 = vector.broadcast %cst_45 : f32 to vector<32x2xf32>
    %82 = arith.maximumf %80, %81 : vector<32x2xf32>
    %cst_46 = arith.constant dense<0.000000e+00> : vector<16x2xf32>
    %83 = tpu.matmul %2, %82, %cst_46 {dimension_numbers = #tpu.dot_dimension_numbers<[1], [0], [0], [1], [0, 0, 1, 1], [], []>} : vector<16x32xf32>, vector<32x2xf32>, vector<16x2xf32> -> vector<16x2xf32>
    %84 = vector.broadcast %5 : vector<16x1xf32> to vector<16x2xf32>
    %85 = arith.addf %83, %84 : vector<16x2xf32>
    %86 = arith.addf %70, %85 : vector<16x2xf32>
    %c5 = arith.constant 5 : index
    %c0_47 = arith.constant 0 : index
    %c0_48 = arith.constant 0 : index
    %87 = vector.load %arg1[%c5, %c0_47, %c0_48] : memref<8x8x2xf32, #tpu.memory_space<vmem>>, vector<1x8x2xf32>
    %88 = vector.shape_cast %87 : vector<1x8x2xf32> to vector<8x2xf32>
    %cst_49 = arith.constant dense<0.000000e+00> : vector<32x2xf32>
    %89 = tpu.matmul %0, %88, %cst_49 {dimension_numbers = #tpu.dot_dimension_numbers<[1], [0], [0], [1], [0, 0, 1, 1], [], []>} : vector<32x8xf32>, vector<8x2xf32>, vector<32x2xf32> -> vector<32x2xf32>
    %90 = vector.broadcast %3 : vector<32x1xf32> to vector<32x2xf32>
    %91 = arith.addf %89, %90 : vector<32x2xf32>
    %cst_50 = arith.constant 0.000000e+00 : f32
    %92 = vector.broadcast %cst_50 : f32 to vector<32x2xf32>
    %93 = arith.maximumf %91, %92 : vector<32x2xf32>
    %cst_51 = arith.constant dense<0.000000e+00> : vector<32x2xf32>
    %94 = tpu.matmul %1, %93, %cst_51 {dimension_numbers = #tpu.dot_dimension_numbers<[1], [0], [0], [1], [0, 0, 1, 1], [], []>} : vector<32x32xf32>, vector<32x2xf32>, vector<32x2xf32> -> vector<32x2xf32>
    %95 = vector.broadcast %4 : vector<32x1xf32> to vector<32x2xf32>
    %96 = arith.addf %94, %95 : vector<32x2xf32>
    %cst_52 = arith.constant 0.000000e+00 : f32
    %97 = vector.broadcast %cst_52 : f32 to vector<32x2xf32>
    %98 = arith.maximumf %96, %97 : vector<32x2xf32>
    %cst_53 = arith.constant dense<0.000000e+00> : vector<16x2xf32>
    %99 = tpu.matmul %2, %98, %cst_53 {dimension_numbers = #tpu.dot_dimension_numbers<[1], [0], [0], [1], [0, 0, 1, 1], [], []>} : vector<16x32xf32>, vector<32x2xf32>, vector<16x2xf32> -> vector<16x2xf32>
    %100 = vector.broadcast %5 : vector<16x1xf32> to vector<16x2xf32>
    %101 = arith.addf %99, %100 : vector<16x2xf32>
    %102 = arith.addf %86, %101 : vector<16x2xf32>
    %c6 = arith.constant 6 : index
    %c0_54 = arith.constant 0 : index
    %c0_55 = arith.constant 0 : index
    %103 = vector.load %arg1[%c6, %c0_54, %c0_55] : memref<8x8x2xf32, #tpu.memory_space<vmem>>, vector<1x8x2xf32>
    %104 = vector.shape_cast %103 : vector<1x8x2xf32> to vector<8x2xf32>
    %cst_56 = arith.constant dense<0.000000e+00> : vector<32x2xf32>
    %105 = tpu.matmul %0, %104, %cst_56 {dimension_numbers = #tpu.dot_dimension_numbers<[1], [0], [0], [1], [0, 0, 1, 1], [], []>} : vector<32x8xf32>, vector<8x2xf32>, vector<32x2xf32> -> vector<32x2xf32>
    %106 = vector.broadcast %3 : vector<32x1xf32> to vector<32x2xf32>
    %107 = arith.addf %105, %106 : vector<32x2xf32>
    %cst_57 = arith.constant 0.000000e+00 : f32
    %108 = vector.broadcast %cst_57 : f32 to vector<32x2xf32>
    %109 = arith.maximumf %107, %108 : vector<32x2xf32>
    %cst_58 = arith.constant dense<0.000000e+00> : vector<32x2xf32>
    %110 = tpu.matmul %1, %109, %cst_58 {dimension_numbers = #tpu.dot_dimension_numbers<[1], [0], [0], [1], [0, 0, 1, 1], [], []>} : vector<32x32xf32>, vector<32x2xf32>, vector<32x2xf32> -> vector<32x2xf32>
    %111 = vector.broadcast %4 : vector<32x1xf32> to vector<32x2xf32>
    %112 = arith.addf %110, %111 : vector<32x2xf32>
    %cst_59 = arith.constant 0.000000e+00 : f32
    %113 = vector.broadcast %cst_59 : f32 to vector<32x2xf32>
    %114 = arith.maximumf %112, %113 : vector<32x2xf32>
    %cst_60 = arith.constant dense<0.000000e+00> : vector<16x2xf32>
    %115 = tpu.matmul %2, %114, %cst_60 {dimension_numbers = #tpu.dot_dimension_numbers<[1], [0], [0], [1], [0, 0, 1, 1], [], []>} : vector<16x32xf32>, vector<32x2xf32>, vector<16x2xf32> -> vector<16x2xf32>
    %116 = vector.broadcast %5 : vector<16x1xf32> to vector<16x2xf32>
    %117 = arith.addf %115, %116 : vector<16x2xf32>
    %118 = arith.addf %102, %117 : vector<16x2xf32>
    %c7 = arith.constant 7 : index
    %c0_61 = arith.constant 0 : index
    %c0_62 = arith.constant 0 : index
    %119 = vector.load %arg1[%c7, %c0_61, %c0_62] : memref<8x8x2xf32, #tpu.memory_space<vmem>>, vector<1x8x2xf32>
    %120 = vector.shape_cast %119 : vector<1x8x2xf32> to vector<8x2xf32>
    %cst_63 = arith.constant dense<0.000000e+00> : vector<32x2xf32>
    %121 = tpu.matmul %0, %120, %cst_63 {dimension_numbers = #tpu.dot_dimension_numbers<[1], [0], [0], [1], [0, 0, 1, 1], [], []>} : vector<32x8xf32>, vector<8x2xf32>, vector<32x2xf32> -> vector<32x2xf32>
    %122 = vector.broadcast %3 : vector<32x1xf32> to vector<32x2xf32>
    %123 = arith.addf %121, %122 : vector<32x2xf32>
    %cst_64 = arith.constant 0.000000e+00 : f32
    %124 = vector.broadcast %cst_64 : f32 to vector<32x2xf32>
    %125 = arith.maximumf %123, %124 : vector<32x2xf32>
    %cst_65 = arith.constant dense<0.000000e+00> : vector<32x2xf32>
    %126 = tpu.matmul %1, %125, %cst_65 {dimension_numbers = #tpu.dot_dimension_numbers<[1], [0], [0], [1], [0, 0, 1, 1], [], []>} : vector<32x32xf32>, vector<32x2xf32>, vector<32x2xf32> -> vector<32x2xf32>
    %127 = vector.broadcast %4 : vector<32x1xf32> to vector<32x2xf32>
    %128 = arith.addf %126, %127 : vector<32x2xf32>
    %cst_66 = arith.constant 0.000000e+00 : f32
    %129 = vector.broadcast %cst_66 : f32 to vector<32x2xf32>
    %130 = arith.maximumf %128, %129 : vector<32x2xf32>
    %cst_67 = arith.constant dense<0.000000e+00> : vector<16x2xf32>
    %131 = tpu.matmul %2, %130, %cst_67 {dimension_numbers = #tpu.dot_dimension_numbers<[1], [0], [0], [1], [0, 0, 1, 1], [], []>} : vector<16x32xf32>, vector<32x2xf32>, vector<16x2xf32> -> vector<16x2xf32>
    %132 = vector.broadcast %5 : vector<16x1xf32> to vector<16x2xf32>
    %133 = arith.addf %131, %132 : vector<16x2xf32>
    %134 = arith.addf %118, %133 : vector<16x2xf32>
    %cst_68 = arith.constant 1.250000e-01 : f32
    %135 = vector.broadcast %cst_68 : f32 to vector<16x2xf32>
    %136 = arith.mulf %134, %135 : vector<16x2xf32>
    %c0_69 = arith.constant 0 : index
    %c0_70 = arith.constant 0 : index
    %137 = vector.load %arg8[%c0_69, %c0_70] : memref<16x2xf32, #tpu.memory_space<vmem>>, vector<16x2xf32>
    tpu.vector_store %arg8[%c0_69, %c0_70], %136 {strides = array<i32>} : memref<16x2xf32, #tpu.memory_space<vmem>>, vector<16x2xf32>,
    return
  }
  func.func @transform_0(%arg0: i32) -> (i32, i32, i32) {
    %c0_i32 = arith.constant 0 : i32
    %c0_i32_0 = arith.constant 0 : i32
    %c0_i32_1 = arith.constant 0 : i32
    return %c0_i32, %c0_i32_0, %arg0 : i32, i32, i32
  }
  func.func @transform_1(%arg0: i32) -> (i32, i32) {
    %c0_i32 = arith.constant 0 : i32
    %c0_i32_0 = arith.constant 0 : i32
    %c0_i32_1 = arith.constant 0 : i32
    return %c0_i32, %c0_i32_0 : i32, i32
  }
  func.func @transform_2(%arg0: i32) -> (i32, i32) {
    %c0_i32 = arith.constant 0 : i32
    %c0_i32_0 = arith.constant 0 : i32
    %c0_i32_1 = arith.constant 0 : i32
    return %c0_i32, %c0_i32_0 : i32, i32
  }
  func.func @transform_3(%arg0: i32) -> (i32, i32) {
    %c0_i32 = arith.constant 0 : i32
    %c0_i32_0 = arith.constant 0 : i32
    %c0_i32_1 = arith.constant 0 : i32
    return %c0_i32, %c0_i32_0 : i32, i32
  }
  func.func @transform_4(%arg0: i32) -> (i32, i32) {
    %c0_i32 = arith.constant 0 : i32
    %c0_i32_0 = arith.constant 0 : i32
    %c0_i32_1 = arith.constant 0 : i32
    return %c0_i32, %c0_i32_0 : i32, i32
  }
  func.func @transform_5(%arg0: i32) -> (i32, i32) {
    %c0_i32 = arith.constant 0 : i32
    %c0_i32_0 = arith.constant 0 : i32
    %c0_i32_1 = arith.constant 0 : i32
    return %c0_i32, %c0_i32_0 : i32, i32
  }
  func.func @transform_6(%arg0: i32) -> (i32, i32) {
    %c0_i32 = arith.constant 0 : i32
    %c0_i32_0 = arith.constant 0 : i32
    %c0_i32_1 = arith.constant 0 : i32
    return %c0_i32, %c0_i32_0 : i32, i32
  }
  func.func @transform_7(%arg0: i32) -> (i32, i32) {
    %c0_i32 = arith.constant 0 : i32
    %c0_i32_0 = arith.constant 0 : i32
    return %c0_i32, %arg0 : i32, i32
  }
}

</mosaic_0001>

<bundles_post_ra>
// kernel: tpu_custom_call.1
= control target key start
LH: loop header
LB: loop body
LE: loop exit
PB: predicated region body
PF: predicated region fallthrough
CT: control target
= control target key end

     0   :  { %vm67_vm0 = vcmask 64512   ;;  %v2856_v3 = vmov 0   ;;  %vm189_vm1 = vcmask 261120   ;;  %vm2185_vm2 = vcmask 15360   ;;  %s3247_s0 = inlined_call_operand.vmem [shape: f32[8,8,2], index: 0, kind: input, shape index: {}]   ;;  %s3248_s1 = inlined_call_operand.vmem [shape: f32[32,8], index: 1, kind: input, shape index: {}]   ;;  %s3249_s2 = inlined_call_operand.vmem [shape: f32[32,1], index: 2, kind: input, shape index: {}]   ;;  %s3250_s4 = inlined_call_operand.vmem [shape: f32[32,1], index: 4, kind: input, shape index: {}]   ;;  %s3251_s6 = inlined_call_operand.vmem [shape: f32[16,1], index: 6, kind: input, shape index: {}]   ;;  %s3252_s3 = inlined_call_operand.vmem [shape: f32[32,32], index: 3, kind: input, shape index: {}]   ;;  %s3253_s5 = inlined_call_operand.vmem [shape: f32[16,32], index: 5, kind: input, shape index: {}]   ;;  %s3254_s7 = inlined_call_operand.vmem [shape: f32[16,2], index: 7, kind: output, shape index: {}]  }
   0x1   :  { %v46_v0 = vld [vmem:[%s3247_s0] sm:$0xff]  ;;  %v2908_v2 = vld [vmem:[%s3248_s1 + $0x8] sm:$0xff]  ;;  %2854 = vset.pattern.permute.xlu0 %v2856_v3  ;;  %2855 = vset.pattern.permute.xlu1 %v2856_v3  ;;  %v2915_v4 = vld [vmem:[%s3248_s1 + $0x10] sm:$0xff] }
   0x2   :  { %v2903_v1 = vld [vmem:[%s3248_s1] sm:$0xff]  ;;  %2431 = vmatprep.subr.mxu0 %v46_v0  ;;  %v38_v6 = vld [vmem:[%s3249_s2 + $0x10] sm:$0xff]  ;;  %v37_v7 = vld [vmem:[%s3249_s2 + $0x8] sm:$0xff] }
   0x3   :  { %2433 = vmatprep.mubr.msk.f32.mxu0 %vm67_vm0, %v2903_v1  ;;  %v36_v5 = vld [vmem:[%s3249_s2] sm:$0xff]  ;;  %2432 = vmatpush3.msra.mxu0 %v46_v0  ;;  %v2933_v8 = vld [vmem:[%s3248_s1 + $0x18] sm:$0xff]  ;;  %v41_v11 = vld [vmem:[%s3250_s4 + $0x8] sm:$0xff] }
   0x4   :  { %49 = vperm.xlu0 %2854, %v36_v5   ;;  %2434 = vmatmul.mubr.msk.f32.vlgmr.msra.gmra.mrb[0].mxu0 %vm67_vm0, %v2908_v2  ;;  %v39_v9 = vld [vmem:[%s3249_s2 + $0x18] sm:$0xff]  ;;  %v40_v10 = vld [vmem:[%s3250_s4] sm:$0xff]  ;;  %v42_v12 = vld [vmem:[%s3250_s4 + $0x10] sm:$0xff] }
   0x5   :  { %59 = vperm.xlu1 %2855, %v38_v6   ;;  %2436 = vmatprep.mubr.msk.f32.mxu0 %vm67_vm0, %v2915_v4  ;;  %v43_v13 = vld [vmem:[%s3250_s4 + $0x18] sm:$0xff]  ;;  %v44_v14 = vld [vmem:[%s3251_s6] sm:$0xff]  ;;  %v45_v15 = vld [vmem:[%s3251_s6 + $0x8] sm:$0xff] }
   0x6   :  { %v2961_v16 = vld [vmem:[%s3252_s3] sm:$0xff]  ;;  %v2980_v35 = vld [vmem:[%s3252_s3 + $0x8] sm:$0xff]  ;;  %v2985_v36 = vld [vmem:[%s3252_s3 + $0x10] sm:$0xff] }
   0x7   :  { %2447 = vmatprep.mubr.msk.f32.mxu1 %vm189_vm1, %v2961_v16  ;;  %v2994_v37 = vld [vmem:[%s3252_s3 + $0x18] sm:$0xff]  ;;  %v3003_v38 = vld [vmem:[%s3253_s5] sm:$0xff]  ;;  %v2202_v57 = vld [vmem:[%s3247_s0 + $0x8] sm:$0xff] }
   0x8   :  { %54 = vperm.xlu0 %2854, %v37_v7   ;;  %2437 = vmatmul.mubr.msk.f32.gmra.mrb[2].mxu0 %vm67_vm0, %v2933_v8  ;;  %v3025_v58 = vld [vmem:[%s3253_s5 + $0x8] sm:$0xff] }
   0x9   :  { %64 = vperm.xlu1 %2855, %v39_v9   ;;  %2461 = vmatprep.mubr.msk.f32.mxu0 %vm189_vm1, %v3003_v38 }
   0xc   :  { %171 = vperm.xlu0 %2854, %v40_v10  }
   0xd   :  { %176 = vperm.xlu1 %2855, %v41_v11  }
  0x10   :  { %181 = vperm.xlu0 %2854, %v42_v12  }
  0x11   :  { %186 = vperm.xlu1 %2855, %v43_v13   ;;  %v2213_v13 = vld [vmem:[%s3247_s0 + $0x10] sm:$0xff] }
  0x14   :  { %293 = vperm.xlu0 %2854, %v44_v14   ;;  %v2224_v14 = vld [vmem:[%s3247_s0 + $0x18] sm:$0xff] }
  0x15   :  { %298 = vperm.xlu1 %2855, %v45_v15  }
  0x83   :  { %v2965_v17 = vpop.permute.xlu0 %49 }
  0x84   :  { %v2967_v18 = vpop.permute.xlu1 %59 }
  0x87   :  { %v2969_v19 = vpop.permute.xlu0 %54 }
  0x88   :  { %v2973_v25 = vpop.permute.xlu1 %64 }
  0x8b   :  { %v3009_v40 = vpop.permute.xlu0 %171 }
  0x8c   :  { %v3007_v39 = vpop.permute.xlu1 %176 }
  0x8f   :  { %v3015_v49 = vpop.permute.xlu0 %181 }
  0x90   :  { %v3013_v46 = vpop.permute.xlu1 %186 }
  0xd7   :  { %v2435_v20 = vpop.f32.mrb[0].mxu0 }
  0xd8   :  { %v152_v21 = vadd.f32 %v2435_v20, %v2969_v19  ;;  %v146_v22 = vpop.f32.mrb[1].mxu0 }
  0xd9   :  { %v147_v23 = vadd.f32 %v146_v22, %v2965_v17 }
  0xda   :  { %v166_v24 = vmax.f32 %v152_v21, 0.0 }
  0xdb   :  { %v165_v26 = vmax.f32 %v147_v23, 0.0  ;;  %v2438_v27 = vpop.f32.mrb[2].mxu0 }
  0xdc   :  { %v162_v28 = vadd.f32 %v2438_v27, %v2973_v25  ;;  %v156_v29 = vpop.f32.mrb[3].mxu0 }
  0xdd   :  { %v157_v30 = vadd.f32 %v156_v29, %v2967_v18  ;;  %v2695_v31 = vpack.c.bf16 %v166_v24, %v165_v26 }
  0xde   :  { %v168_v32 = vmax.f32 %v162_v28, 0.0 }
  0xdf   :  { %v167_v33 = vmax.f32 %v157_v30, 0.0  ;;  %2696 = vmatprep.subr.bf16.mxu1 %v2695_v31 }
  0xe0   :  { %2698 = vmatpush3.bf16.msra.mxu1 %v2695_v31 }
  0xe1   :  { %v2699_v34 = vpack.c.bf16 %v168_v32, %v167_v33 }
  0xe3   :  { %2700 = vmatprep.subr.bf16.mxu1 %v2699_v34 }
  0xe4   :  { %2702 = vmatpush3.bf16.msra.mxu1 %v2699_v34 }
  0xe7   :  { %2448 = vmatmul.mubr.msk.f32.vlgmr.msra.gmra.mrb[0].mxu1 %vm189_vm1, %v2980_v35 }
  0xe8   :  { %2450 = vmatprep.mubr.msk.f32.mxu1 %vm189_vm1, %v2985_v36 }
  0xeb   :  { %2451 = vmatmul.mubr.msk.f32.gmra.mrb[2].mxu1 %vm189_vm1, %v2994_v37 }
  0xec   :  { %2480 = vmatprep.mubr.msk.f32.mxu1 %vm189_vm1, %v2961_v16 }
 0x1ba   :  { %v2449_v41 = vpop.f32.mrb[0].mxu1 }
 0x1bb   :  { %v274_v42 = vadd.f32 %v2449_v41, %v3007_v39  ;;  %v268_v43 = vpop.f32.mrb[1].mxu1 }
 0x1bc   :  { %v269_v44 = vadd.f32 %v268_v43, %v3009_v40 }
 0x1bd   :  { %v288_v45 = vmax.f32 %v274_v42, 0.0 }
 0x1be   :  { %v287_v47 = vmax.f32 %v269_v44, 0.0  ;;  %v2452_v48 = vpop.f32.mrb[2].mxu1 }
 0x1bf   :  { %v284_v50 = vadd.f32 %v2452_v48, %v3013_v46  ;;  %v278_v51 = vpop.f32.mrb[3].mxu1 }
 0x1c0   :  { %v2703_v52 = vpack.c.bf16 %v288_v45, %v287_v47  ;;  %v279_v53 = vadd.f32 %v278_v51, %v3015_v49 }
 0x1c1   :  { %v290_v54 = vmax.f32 %v284_v50, 0.0 }
 0x1c2   :  { %v289_v55 = vmax.f32 %v279_v53, 0.0  ;;  %2704 = vmatprep.subr.bf16.mxu0 %v2703_v52 }
 0x1c3   :  { %2706 = vmatpush3.bf16.msra.mxu0 %v2703_v52 }
 0x1c4   :  { %v2707_v56 = vpack.c.bf16 %v290_v54, %v289_v55 }
 0x1c6   :  { %2708 = vmatprep.subr.bf16.mxu0 %v2707_v56 }
 0x1c7   :  { %2710 = vmatpush3.bf16.msra.mxu0 %v2707_v56 }
 0x1c8   :  { %2464 = vmatprep.subr.mxu0 %v2202_v57 }
 0x1ca   :  { %2462 = vmatmul.mubr.msk.f32.vlgmr.msra.gmra.mrb[4].mxu0 %vm189_vm1, %v3025_v58 }
 0x1cb   :  { %2465 = vmatpush3.msra.mxu0 %v2202_v57  ;;  %2466 = vmatprep.mubr.msk.f32.mxu0 %vm67_vm0, %v2903_v1 }
 0x1ce   :  { %2467 = vmatmul.mubr.msk.f32.vlgmr.msra.gmra.mrb[6].mxu0 %vm67_vm0, %v2908_v2 }
 0x1cf   :  { %2469 = vmatprep.mubr.msk.f32.mxu0 %vm67_vm0, %v2915_v4 }
 0x1d2   :  { %2470 = vmatmul.mubr.msk.f32.gmra.mrb[8].mxu0 %vm67_vm0, %v2933_v8 }
 0x1d3   :  { %2494 = vmatprep.mubr.msk.f32.mxu0 %vm189_vm1, %v3003_v38 }
 0x2a1   :  { %v2468_v59 = vpop.f32.mrb[6].mxu0 }
 0x2a2   :  { %v458_v60 = vadd.f32 %v2468_v59, %v2969_v19  ;;  %v452_v61 = vpop.f32.mrb[7].mxu0 }
 0x2a3   :  { %v453_v62 = vadd.f32 %v452_v61, %v2965_v17 }
 0x2a4   :  { %v472_v63 = vmax.f32 %v458_v60, 0.0 }
 0x2a5   :  { %v471_v0 = vmax.f32 %v453_v62, 0.0  ;;  %v2471_v3 = vpop.f32.mrb[8].mxu0 }
 0x2a6   :  { %v468_v5 = vadd.f32 %v2471_v3, %v2973_v25  ;;  %v462_v6 = vpop.f32.mrb[9].mxu0 }
 0x2a7   :  { %v2711_v7 = vpack.c.bf16 %v472_v63, %v471_v0  ;;  %v463_v9 = vadd.f32 %v462_v6, %v2967_v18 }
 0x2a8   :  { %v474_v10 = vmax.f32 %v468_v5, 0.0 }
 0x2a9   :  { %v473_v11 = vmax.f32 %v463_v9, 0.0  ;;  %2712 = vmatprep.subr.bf16.mxu1 %v2711_v7 }
 0x2aa   :  { %2714 = vmatpush3.bf16.msra.mxu1 %v2711_v7 }
 0x2ab   :  { %v2715_v12 = vpack.c.bf16 %v474_v10, %v473_v11  ;;  %v2235_v11 = vld [vmem:[%s3247_s0 + $0x20] sm:$0xff] }
 0x2ad   :  { %2716 = vmatprep.subr.bf16.mxu1 %v2715_v12 }
 0x2ae   :  { %2718 = vmatpush3.bf16.msra.mxu1 %v2715_v12  ;;  %v2246_v12 = vld [vmem:[%s3247_s0 + $0x28] sm:$0xff] }
 0x2af   :  { %2497 = vmatprep.subr.mxu1 %v2213_v13 }
 0x2b1   :  { %2481 = vmatmul.mubr.msk.f32.vlgmr.msra.gmra.mrb[4].mxu1 %vm189_vm1, %v2980_v35 }
 0x2b2   :  { %2498 = vmatpush3.msra.mxu1 %v2213_v13  ;;  %2483 = vmatprep.mubr.msk.f32.mxu1 %vm189_vm1, %v2985_v36 }
 0x2b3   :  { %2530 = vmatprep.subr.mxu1 %v2224_v14 }
 0x2b5   :  { %2484 = vmatmul.mubr.msk.f32.gmra.mrb[6].mxu1 %vm189_vm1, %v2994_v37 }
 0x2b6   :  { %2499 = vmatprep.mubr.msk.f32.mxu1 %vm67_vm0, %v2903_v1 }
 0x2b9   :  { %2500 = vmatmul.mubr.msk.f32.vlgmr.msra.gmra.mrb[8].mxu1 %vm67_vm0, %v2908_v2 }
 0x2ba   :  { %2531 = vmatpush3.msra.mxu1 %v2224_v14  ;;  %2502 = vmatprep.mubr.msk.f32.mxu1 %vm67_vm0, %v2915_v4 }
 0x2bd   :  { %2503 = vmatmul.mubr.msk.f32.gmra.mrb[10].mxu1 %vm67_vm0, %v2933_v8 }
 0x2be   :  { %2532 = vmatprep.mubr.msk.f32.mxu1 %vm67_vm0, %v2903_v1 }
 0x2c1   :  { %2533 = vmatmul.mubr.msk.f32.vlgmr.msra.gmra.mrb[12].mxu1 %vm67_vm0, %v2908_v2 }
 0x2c2   :  { %2535 = vmatprep.mubr.msk.f32.mxu1 %vm67_vm0, %v2915_v4 }
 0x2c5   :  { %2536 = vmatmul.mubr.msk.f32.gmra.mrb[14].mxu1 %vm67_vm0, %v2933_v8 }
 0x2c6   :  { %2546 = vmatprep.mubr.msk.f32.mxu1 %vm189_vm1, %v2961_v16 }
 0x384   :  { %v2482_v15 = vpop.f32.mrb[4].mxu1 }
 0x385   :  { %v547_v20 = vadd.f32 %v2482_v15, %v3007_v39  ;;  %v541_v21 = vpop.f32.mrb[5].mxu1 }
 0x386   :  { %v542_v22 = vadd.f32 %v541_v21, %v3009_v40 }
 0x387   :  { %v561_v23 = vmax.f32 %v547_v20, 0.0 }
 0x388   :  { %v560_v24 = vmax.f32 %v542_v22, 0.0  ;;  %v2485_v26 = vpop.f32.mrb[6].mxu1 }
 0x389   :  { %v557_v27 = vadd.f32 %v2485_v26, %v3013_v46  ;;  %v551_v28 = vpop.f32.mrb[7].mxu1 }
 0x38a   :  { %v2719_v29 = vpack.c.bf16 %v561_v23, %v560_v24  ;;  %v552_v30 = vadd.f32 %v551_v28, %v3015_v49 }
 0x38b   :  { %v563_v31 = vmax.f32 %v557_v27, 0.0 }
 0x38c   :  { %v562_v32 = vmax.f32 %v552_v30, 0.0  ;;  %2720 = vmatprep.subr.bf16.mxu0 %v2719_v29  ;;  %v2501_v33 = vpop.f32.mrb[8].mxu1 }
 0x38d   :  { %v715_v34 = vadd.f32 %v2501_v33, %v2969_v19  ;;  %2722 = vmatpush3.bf16.msra.mxu0 %v2719_v29  ;;  %v709_v41 = vpop.f32.mrb[9].mxu1 }
 0x38e   :  { %v2723_v42 = vpack.c.bf16 %v563_v31, %v562_v32  ;;  %v710_v43 = vadd.f32 %v709_v41, %v2965_v17 }
 0x38f   :  { %v729_v44 = vmax.f32 %v715_v34, 0.0 }
 0x390   :  { %v728_v45 = vmax.f32 %v710_v43, 0.0  ;;  %2724 = vmatprep.subr.bf16.mxu0 %v2723_v42  ;;  %v2504_v47 = vpop.f32.mrb[10].mxu1 }
 0x391   :  { %v725_v48 = vadd.f32 %v2504_v47, %v2973_v25  ;;  %2726 = vmatpush3.bf16.msra.mxu0 %v2723_v42  ;;  %v719_v50 = vpop.f32.mrb[11].mxu1 }
 0x392   :  { %v2727_v51 = vpack.c.bf16 %v729_v44, %v728_v45  ;;  %v720_v52 = vadd.f32 %v719_v50, %v2967_v18 }
 0x393   :  { %v731_v53 = vmax.f32 %v725_v48, 0.0 }
 0x394   :  { %v730_v54 = vmax.f32 %v720_v52, 0.0  ;;  %2728 = vmatprep.subr.bf16.mxu0 %v2727_v51  ;;  %v2534_v55 = vpop.f32.mrb[12].mxu1  ;;  %2495 = vmatmul.mubr.msk.f32.vlgmr.msra.gmra.mrb[4].mxu0 %vm189_vm1, %v3025_v58 }
 0x395   :  { %v972_v56 = vadd.f32 %v2534_v55, %v2969_v19  ;;  %2730 = vmatpush3.bf16.msra.mxu0 %v2727_v51  ;;  %v966_v57 = vpop.f32.mrb[13].mxu1  ;;  %2513 = vmatprep.mubr.msk.f32.mxu0 %vm189_vm1, %v2961_v16 }
 0x396   :  { %v2731_v59 = vpack.c.bf16 %v731_v53, %v730_v54  ;;  %v967_v60 = vadd.f32 %v966_v57, %v2965_v17 }
 0x397   :  { %v986_v61 = vmax.f32 %v972_v56, 0.0 }
 0x398   :  { %v985_v62 = vmax.f32 %v967_v60, 0.0  ;;  %2732 = vmatprep.subr.bf16.mxu0 %v2731_v59  ;;  %v2537_v63 = vpop.f32.mrb[14].mxu1 }
 0x399   :  { %v982_v0 = vadd.f32 %v2537_v63, %v2973_v25  ;;  %2734 = vmatpush3.bf16.msra.mxu0 %v2731_v59  ;;  %v976_v3 = vpop.f32.mrb[15].mxu1 }
 0x39a   :  { %v2743_v5 = vpack.c.bf16 %v986_v61, %v985_v62  ;;  %v977_v6 = vadd.f32 %v976_v3, %v2967_v18 }
 0x39b   :  { %v988_v7 = vmax.f32 %v982_v0, 0.0 }
 0x39c   :  { %v987_v9 = vmax.f32 %v977_v6, 0.0  ;;  %2514 = vmatmul.mubr.msk.f32.vlgmr.msra.gmra.mrb[10].mxu0 %vm189_vm1, %v2980_v35  ;;  %2744 = vmatprep.subr.bf16.mxu1 %v2743_v5 }
 0x39d   :  { %2746 = vmatpush3.bf16.msra.mxu1 %v2743_v5  ;;  %2516 = vmatprep.mubr.msk.f32.mxu0 %vm189_vm1, %v2985_v36 }
 0x39e   :  { %v2747_v10 = vpack.c.bf16 %v988_v7, %v987_v9 }
 0x3a0   :  { %2517 = vmatmul.mubr.msk.f32.gmra.mrb[12].mxu0 %vm189_vm1, %v2994_v37  ;;  %2748 = vmatprep.subr.bf16.mxu1 %v2747_v10 }
 0x3a1   :  { %2750 = vmatpush3.bf16.msra.mxu1 %v2747_v10  ;;  %2527 = vmatprep.mubr.msk.f32.mxu0 %vm189_vm1, %v3003_v38 }
 0x3a2   :  { %2563 = vmatprep.subr.mxu1 %v2235_v11 }
 0x3a4   :  { %2547 = vmatmul.mubr.msk.f32.vlgmr.msra.gmra.mrb[16].mxu1 %vm189_vm1, %v2980_v35 }
 0x3a5   :  { %2564 = vmatpush3.msra.mxu1 %v2235_v11  ;;  %2549 = vmatprep.mubr.msk.f32.mxu1 %vm189_vm1, %v2985_v36 }
 0x3a6   :  { %2596 = vmatprep.subr.mxu1 %v2246_v12 }
 0x3a8   :  { %2550 = vmatmul.mubr.msk.f32.gmra.mrb[18].mxu1 %vm189_vm1, %v2994_v37 }
 0x3a9   :  { %2565 = vmatprep.mubr.msk.f32.mxu1 %vm67_vm0, %v2903_v1 }
 0x3ac   :  { %2566 = vmatmul.mubr.msk.f32.vlgmr.msra.gmra.mrb[20].mxu1 %vm67_vm0, %v2908_v2 }
 0x3ad   :  { %2597 = vmatpush3.msra.mxu1 %v2246_v12  ;;  %2568 = vmatprep.mubr.msk.f32.mxu1 %vm67_vm0, %v2915_v4 }
 0x3b0   :  { %2569 = vmatmul.mubr.msk.f32.gmra.mrb[22].mxu1 %vm67_vm0, %v2933_v8 }
 0x3b1   :  { %2598 = vmatprep.mubr.msk.f32.mxu1 %vm67_vm0, %v2903_v1 }
 0x3b4   :  { %2599 = vmatmul.mubr.msk.f32.vlgmr.msra.gmra.mrb[24].mxu1 %vm67_vm0, %v2908_v2 }
 0x3b5   :  { %2601 = vmatprep.mubr.msk.f32.mxu1 %vm67_vm0, %v2915_v4 }
 0x3b8   :  { %2602 = vmatmul.mubr.msk.f32.gmra.mrb[26].mxu1 %vm67_vm0, %v2933_v8 }
 0x3b9   :  { %2612 = vmatprep.mubr.msk.f32.mxu1 %vm189_vm1, %v2961_v16 }
 0x46f   :  { %v2515_v13 = vpop.f32.mrb[10].mxu0 }
 0x470   :  { %v804_v14 = vadd.f32 %v2515_v13, %v3007_v39  ;;  %v798_v15 = vpop.f32.mrb[11].mxu0 }
 0x471   :  { %v799_v20 = vadd.f32 %v798_v15, %v3009_v40 }
 0x472   :  { %v818_v21 = vmax.f32 %v804_v14, 0.0 }
 0x473   :  { %v817_v22 = vmax.f32 %v799_v20, 0.0  ;;  %v2518_v23 = vpop.f32.mrb[12].mxu0 }
 0x474   :  { %v814_v24 = vadd.f32 %v2518_v23, %v3013_v46  ;;  %v808_v26 = vpop.f32.mrb[13].mxu0 }
 0x475   :  { %v2735_v27 = vpack.c.bf16 %v818_v21, %v817_v22  ;;  %v809_v28 = vadd.f32 %v808_v26, %v3015_v49 }
 0x476   :  { %v820_v29 = vmax.f32 %v814_v24, 0.0 }
 0x477   :  { %v819_v30 = vmax.f32 %v809_v28, 0.0  ;;  %2736 = vmatprep.subr.bf16.mxu0 %v2735_v27  ;;  %v2548_v31 = vpop.f32.mrb[16].mxu1  ;;  %v2257_v28 = vld [vmem:[%s3247_s0 + $0x30] sm:$0xff] }
 0x478   :  { %v1061_v32 = vadd.f32 %v2548_v31, %v3007_v39  ;;  %2738 = vmatpush3.bf16.msra.mxu0 %v2735_v27  ;;  %v1055_v33 = vpop.f32.mrb[17].mxu1 }
 0x479   :  { %v2739_v34 = vpack.c.bf16 %v820_v29, %v819_v30  ;;  %v1056_v41 = vadd.f32 %v1055_v33, %v3009_v40  ;;  %v2268_v29 = vld [vmem:[%s3247_s0 + $0x38] sm:$0xff] }
 0x47a   :  { %v1075_v42 = vmax.f32 %v1061_v32, 0.0 }
 0x47b   :  { %v1074_v43 = vmax.f32 %v1056_v41, 0.0  ;;  %2740 = vmatprep.subr.bf16.mxu0 %v2739_v34  ;;  %v2551_v44 = vpop.f32.mrb[18].mxu1 }
 0x47c   :  { %v1071_v45 = vadd.f32 %v2551_v44, %v3013_v46  ;;  %2742 = vmatpush3.bf16.msra.mxu0 %v2739_v34  ;;  %v1065_v47 = vpop.f32.mrb[19].mxu1 }
 0x47d   :  { %v2751_v48 = vpack.c.bf16 %v1075_v42, %v1074_v43  ;;  %v1066_v50 = vadd.f32 %v1065_v47, %v3015_v49 }
 0x47e   :  { %v1077_v51 = vmax.f32 %v1071_v45, 0.0 }
 0x47f   :  { %v1076_v52 = vmax.f32 %v1066_v50, 0.0  ;;  %2752 = vmatprep.subr.bf16.mxu0 %v2751_v48  ;;  %v2567_v53 = vpop.f32.mrb[20].mxu1  ;;  %2528 = vmatmul.mubr.msk.f32.vlgmr.msra.gmra.mrb[4].mxu0 %vm189_vm1, %v3025_v58 }
 0x480   :  { %v1229_v54 = vadd.f32 %v2567_v53, %v2969_v19  ;;  %2754 = vmatpush3.bf16.msra.mxu0 %v2751_v48  ;;  %v1223_v55 = vpop.f32.mrb[21].mxu1  ;;  %2560 = vmatprep.mubr.msk.f32.mxu0 %vm189_vm1, %v3003_v38 }
 0x481   :  { %v2755_v56 = vpack.c.bf16 %v1077_v51, %v1076_v52  ;;  %v1224_v57 = vadd.f32 %v1223_v55, %v2965_v17 }
 0x482   :  { %v1243_v59 = vmax.f32 %v1229_v54, 0.0 }
 0x483   :  { %v1242_v60 = vmax.f32 %v1224_v57, 0.0  ;;  %2756 = vmatprep.subr.bf16.mxu0 %v2755_v56  ;;  %v2570_v61 = vpop.f32.mrb[22].mxu1 }
 0x484   :  { %v1239_v62 = vadd.f32 %v2570_v61, %v2973_v25  ;;  %2758 = vmatpush3.bf16.msra.mxu0 %v2755_v56  ;;  %v1233_v63 = vpop.f32.mrb[23].mxu1 }
 0x485   :  { %v2759_v0 = vpack.c.bf16 %v1243_v59, %v1242_v60  ;;  %v1234_v3 = vadd.f32 %v1233_v63, %v2967_v18 }
 0x486   :  { %v1245_v5 = vmax.f32 %v1239_v62, 0.0 }
 0x487   :  { %v1244_v6 = vmax.f32 %v1234_v3, 0.0  ;;  %2760 = vmatprep.subr.bf16.mxu0 %v2759_v0  ;;  %v2600_v7 = vpop.f32.mrb[24].mxu1  ;;  %2561 = vmatmul.mubr.msk.f32.vlgmr.msra.gmra.mrb[4].mxu0 %vm189_vm1, %v3025_v58 }
 0x488   :  { %v1486_v9 = vadd.f32 %v2600_v7, %v2969_v19  ;;  %2762 = vmatpush3.bf16.msra.mxu0 %v2759_v0  ;;  %v1480_v10 = vpop.f32.mrb[25].mxu1  ;;  %2579 = vmatprep.mubr.msk.f32.mxu0 %vm189_vm1, %v2961_v16 }
 0x489   :  { %v2763_v11 = vpack.c.bf16 %v1245_v5, %v1244_v6  ;;  %v1481_v12 = vadd.f32 %v1480_v10, %v2965_v17 }
 0x48a   :  { %v1500_v13 = vmax.f32 %v1486_v9, 0.0 }
 0x48b   :  { %v1499_v14 = vmax.f32 %v1481_v12, 0.0  ;;  %2764 = vmatprep.subr.bf16.mxu0 %v2763_v11  ;;  %v2603_v15 = vpop.f32.mrb[26].mxu1 }
 0x48c   :  { %v1496_v20 = vadd.f32 %v2603_v15, %v2973_v25  ;;  %2766 = vmatpush3.bf16.msra.mxu0 %v2763_v11  ;;  %v1490_v21 = vpop.f32.mrb[27].mxu1 }
 0x48d   :  { %v2775_v22 = vpack.c.bf16 %v1500_v13, %v1499_v14  ;;  %v1491_v23 = vadd.f32 %v1490_v21, %v2967_v18 }
 0x48e   :  { %v1502_v24 = vmax.f32 %v1496_v20, 0.0 }
 0x48f   :  { %v1501_v26 = vmax.f32 %v1491_v23, 0.0  ;;  %2580 = vmatmul.mubr.msk.f32.vlgmr.msra.gmra.mrb[14].mxu0 %vm189_vm1, %v2980_v35  ;;  %2776 = vmatprep.subr.bf16.mxu1 %v2775_v22 }
 0x490   :  { %2778 = vmatpush3.bf16.msra.mxu1 %v2775_v22  ;;  %2582 = vmatprep.mubr.msk.f32.mxu0 %vm189_vm1, %v2985_v36 }
 0x491   :  { %v2779_v27 = vpack.c.bf16 %v1502_v24, %v1501_v26 }
 0x493   :  { %2583 = vmatmul.mubr.msk.f32.gmra.mrb[16].mxu0 %vm189_vm1, %v2994_v37  ;;  %2780 = vmatprep.subr.bf16.mxu1 %v2779_v27 }
 0x494   :  { %2782 = vmatpush3.bf16.msra.mxu1 %v2779_v27  ;;  %2593 = vmatprep.mubr.msk.f32.mxu0 %vm189_vm1, %v3003_v38 }
 0x495   :  { %2629 = vmatprep.subr.mxu1 %v2257_v28 }
 0x497   :  { %2613 = vmatmul.mubr.msk.f32.vlgmr.msra.gmra.mrb[28].mxu1 %vm189_vm1, %v2980_v35 }
 0x498   :  { %2630 = vmatpush3.msra.mxu1 %v2257_v28  ;;  %2615 = vmatprep.mubr.msk.f32.mxu1 %vm189_vm1, %v2985_v36 }
 0x499   :  { %2662 = vmatprep.subr.mxu1 %v2268_v29 }
 0x49b   :  { %2616 = vmatmul.mubr.msk.f32.gmra.mrb[30].mxu1 %vm189_vm1, %v2994_v37 }
 0x49c   :  { %2631 = vmatprep.mubr.msk.f32.mxu1 %vm67_vm0, %v2903_v1 }
 0x49f   :  { %2632 = vmatmul.mubr.msk.f32.vlgmr.msra.gmra.mrb[32].mxu1 %vm67_vm0, %v2908_v2 }
 0x4a0   :  { %2663 = vmatpush3.msra.mxu1 %v2268_v29  ;;  %2634 = vmatprep.mubr.msk.f32.mxu1 %vm67_vm0, %v2915_v4 }
 0x4a3   :  { %2635 = vmatmul.mubr.msk.f32.gmra.mrb[34].mxu1 %vm67_vm0, %v2933_v8 }
 0x4a4   :  { %2664 = vmatprep.mubr.msk.f32.mxu1 %vm67_vm0, %v2903_v1 }
 0x4a7   :  { %2665 = vmatmul.mubr.msk.f32.vlgmr.msra.gmra.mrb[36].mxu1 %vm67_vm0, %v2908_v2 }
 0x4a8   :  { %2667 = vmatprep.mubr.msk.f32.mxu1 %vm67_vm0, %v2915_v4 }
 0x4ab   :  { %2668 = vmatmul.mubr.msk.f32.gmra.mrb[38].mxu1 %vm67_vm0, %v2933_v8 }
 0x4ac   :  { %2678 = vmatprep.mubr.msk.f32.mxu1 %vm189_vm1, %v2961_v16 }
 0x562   :  { %v2581_v30 = vpop.f32.mrb[14].mxu0 }
 0x563   :  { %v1318_v31 = vadd.f32 %v2581_v30, %v3007_v39  ;;  %v1312_v32 = vpop.f32.mrb[15].mxu0 }
 0x564   :  { %v1313_v33 = vadd.f32 %v1312_v32, %v3009_v40 }
 0x565   :  { %v1332_v34 = vmax.f32 %v1318_v31, 0.0 }
 0x566   :  { %v1331_v1 = vmax.f32 %v1313_v33, 0.0  ;;  %v2584_v41 = vpop.f32.mrb[16].mxu0 }
 0x567   :  { %v1328_v2 = vadd.f32 %v2584_v41, %v3013_v46  ;;  %v1322_v42 = vpop.f32.mrb[17].mxu0 }
 0x568   :  { %v2767_v43 = vpack.c.bf16 %v1332_v34, %v1331_v1  ;;  %v1323_v4 = vadd.f32 %v1322_v42, %v3015_v49 }
 0x569   :  { %v1334_v44 = vmax.f32 %v1328_v2, 0.0 }
 0x56a   :  { %v1333_v8 = vmax.f32 %v1323_v4, 0.0  ;;  %2768 = vmatprep.subr.bf16.mxu0 %v2767_v43  ;;  %v2614_v45 = vpop.f32.mrb[28].mxu1 }
 0x56b   :  { %v1575_v47 = vadd.f32 %v2614_v45, %v3007_v39  ;;  %2770 = vmatpush3.bf16.msra.mxu0 %v2767_v43  ;;  %v1569_v48 = vpop.f32.mrb[29].mxu1 }
 0x56c   :  { %v2771_v50 = vpack.c.bf16 %v1334_v44, %v1333_v8  ;;  %v1570_v51 = vadd.f32 %v1569_v48, %v3009_v40 }
 0x56d   :  { %v1589_v52 = vmax.f32 %v1575_v47, 0.0 }
 0x56e   :  { %v1588_v53 = vmax.f32 %v1570_v51, 0.0  ;;  %2772 = vmatprep.subr.bf16.mxu0 %v2771_v50  ;;  %v2617_v54 = vpop.f32.mrb[30].mxu1 }
 0x56f   :  { %v1585_v55 = vadd.f32 %v2617_v54, %v3013_v46  ;;  %2774 = vmatpush3.bf16.msra.mxu0 %v2771_v50  ;;  %v1579_v56 = vpop.f32.mrb[31].mxu1 }
 0x570   :  { %v2783_v57 = vpack.c.bf16 %v1589_v52, %v1588_v53  ;;  %v1580_v59 = vadd.f32 %v1579_v56, %v3015_v49 }
 0x571   :  { %v1591_v60 = vmax.f32 %v1585_v55, 0.0 }
 0x572   :  { %v1590_v61 = vmax.f32 %v1580_v59, 0.0  ;;  %2784 = vmatprep.subr.bf16.mxu0 %v2783_v57  ;;  %v2633_v62 = vpop.f32.mrb[32].mxu1  ;;  %2594 = vmatmul.mubr.msk.f32.vlgmr.msra.gmra.mrb[4].mxu0 %vm189_vm1, %v3025_v58 }
 0x573   :  { %v1743_v63 = vadd.f32 %v2633_v62, %v2969_v19  ;;  %2786 = vmatpush3.bf16.msra.mxu0 %v2783_v57  ;;  %v1737_v0 = vpop.f32.mrb[33].mxu1  ;;  %2626 = vmatprep.mubr.msk.f32.mxu0 %vm189_vm1, %v3003_v38 }
 0x574   :  { %v2787_v3 = vpack.c.bf16 %v1591_v60, %v1590_v61  ;;  %v1738_v5 = vadd.f32 %v1737_v0, %v2965_v17 }
 0x575   :  { %v1757_v6 = vmax.f32 %v1743_v63, 0.0 }
 0x576   :  { %v1756_v7 = vmax.f32 %v1738_v5, 0.0  ;;  %2788 = vmatprep.subr.bf16.mxu0 %v2787_v3  ;;  %v2636_v9 = vpop.f32.mrb[34].mxu1 }
 0x577   :  { %v1753_v10 = vadd.f32 %v2636_v9, %v2973_v25  ;;  %2790 = vmatpush3.bf16.msra.mxu0 %v2787_v3  ;;  %v1747_v11 = vpop.f32.mrb[35].mxu1 }
 0x578   :  { %v2791_v12 = vpack.c.bf16 %v1757_v6, %v1756_v7  ;;  %v1748_v13 = vadd.f32 %v1747_v11, %v2967_v18 }
 0x579   :  { %v1759_v14 = vmax.f32 %v1753_v10, 0.0 }
 0x57a   :  { %v1758_v15 = vmax.f32 %v1748_v13, 0.0  ;;  %2792 = vmatprep.subr.bf16.mxu0 %v2791_v12  ;;  %v2666_v20 = vpop.f32.mrb[36].mxu1  ;;  %2627 = vmatmul.mubr.msk.f32.vlgmr.msra.gmra.mrb[4].mxu0 %vm189_vm1, %v3025_v58 }
 0x57b   :  { %v2000_v21 = vadd.f32 %v2666_v20, %v2969_v19  ;;  %2794 = vmatpush3.bf16.msra.mxu0 %v2791_v12  ;;  %v1994_v22 = vpop.f32.mrb[37].mxu1  ;;  %2645 = vmatprep.mubr.msk.f32.mxu0 %vm189_vm1, %v2961_v16 }
 0x57c   :  { %v2795_v23 = vpack.c.bf16 %v1759_v14, %v1758_v15  ;;  %v1995_v24 = vadd.f32 %v1994_v22, %v2965_v17 }
 0x57d   :  { %v2014_v26 = vmax.f32 %v2000_v21, 0.0 }
 0x57e   :  { %v2013_v27 = vmax.f32 %v1995_v24, 0.0  ;;  %2796 = vmatprep.subr.bf16.mxu0 %v2795_v23  ;;  %v2669_v28 = vpop.f32.mrb[38].mxu1 }
 0x57f   :  { %v2010_v29 = vadd.f32 %v2669_v28, %v2973_v25  ;;  %2798 = vmatpush3.bf16.msra.mxu0 %v2795_v23  ;;  %v2004_v30 = vpop.f32.mrb[39].mxu1 }
 0x580   :  { %v2807_v31 = vpack.c.bf16 %v2014_v26, %v2013_v27  ;;  %v2005_v32 = vadd.f32 %v2004_v30, %v2967_v18 }
 0x581   :  { %v2016_v19 = vmax.f32 %v2010_v29, 0.0 }
 0x582   :  { %v2015_v33 = vmax.f32 %v2005_v32, 0.0  ;;  %2646 = vmatmul.mubr.msk.f32.vlgmr.msra.gmra.mrb[18].mxu0 %vm189_vm1, %v2980_v35  ;;  %2808 = vmatprep.subr.bf16.mxu1 %v2807_v31 }
 0x583   :  { %2810 = vmatpush3.bf16.msra.mxu1 %v2807_v31  ;;  %2648 = vmatprep.mubr.msk.f32.mxu0 %vm189_vm1, %v2985_v36 }
 0x584   :  { %v2811_v16 = vpack.c.bf16 %v2016_v19, %v2015_v33 }
 0x586   :  { %2649 = vmatmul.mubr.msk.f32.gmra.mrb[20].mxu0 %vm189_vm1, %v2994_v37  ;;  %2812 = vmatprep.subr.bf16.mxu1 %v2811_v16 }
 0x587   :  { %2814 = vmatpush3.bf16.msra.mxu1 %v2811_v16  ;;  %2659 = vmatprep.mubr.msk.f32.mxu0 %vm189_vm1, %v3003_v38 }
 0x58a   :  { %2679 = vmatmul.mubr.msk.f32.vlgmr.msra.gmra.mrb[40].mxu1 %vm189_vm1, %v2980_v35 }
 0x58b   :  { %2681 = vmatprep.mubr.msk.f32.mxu1 %vm189_vm1, %v2985_v36 }
 0x58e   :  { %2682 = vmatmul.mubr.msk.f32.gmra.mrb[42].mxu1 %vm189_vm1, %v2994_v37 }
 0x655   :  { %v2647_v17 = vpop.f32.mrb[18].mxu0 }
 0x656   :  { %v1832_v18 = vadd.f32 %v2647_v17, %v3007_v39  ;;  %v1826_v25 = vpop.f32.mrb[19].mxu0 }
 0x657   :  { %v1827_v34 = vadd.f32 %v1826_v25, %v3009_v40 }
 0x658   :  { %v1846_v1 = vmax.f32 %v1832_v18, 0.0 }
 0x659   :  { %v1845_v41 = vmax.f32 %v1827_v34, 0.0  ;;  %v2650_v2 = vpop.f32.mrb[20].mxu0 }
 0x65a   :  { %v1842_v42 = vadd.f32 %v2650_v2, %v3013_v46  ;;  %v1836_v43 = vpop.f32.mrb[21].mxu0 }
 0x65b   :  { %v2799_v4 = vpack.c.bf16 %v1846_v1, %v1845_v41  ;;  %v1837_v35 = vadd.f32 %v1836_v43, %v3015_v49 }
 0x65c   :  { %v1848_v44 = vmax.f32 %v1842_v42, 0.0 }
 0x65d   :  { %v1847_v36 = vmax.f32 %v1837_v35, 0.0  ;;  %2800 = vmatprep.subr.bf16.mxu0 %v2799_v4  ;;  %v2680_v8 = vpop.f32.mrb[40].mxu1 }
 0x65e   :  { %v2089_v37 = vadd.f32 %v2680_v8, %v3007_v39  ;;  %2802 = vmatpush3.bf16.msra.mxu0 %v2799_v4  ;;  %v2083_v45 = vpop.f32.mrb[41].mxu1 }
 0x65f   :  { %v2803_v47 = vpack.c.bf16 %v1848_v44, %v1847_v36  ;;  %v2084_v48 = vadd.f32 %v2083_v45, %v3009_v40  ;;  %v299_v40 = vpop.permute.xlu1 %298 }
 0x660   :  { %v2103_v50 = vmax.f32 %v2089_v37, 0.0  ;;  %v2823_v60 = vadd.f32 %v299_v40, %v299_v40 }
 0x661   :  { %v2102_v51 = vmax.f32 %v2084_v48, 0.0  ;;  %2804 = vmatprep.subr.bf16.mxu0 %v2803_v47  ;;  %v2683_v52 = vpop.f32.mrb[42].mxu1 }
 0x662   :  { %v2099_v53 = vadd.f32 %v2683_v52, %v3013_v46  ;;  %2806 = vmatpush3.bf16.msra.mxu0 %v2803_v47  ;;  %v2093_v54 = vpop.f32.mrb[43].mxu1  ;;  %v294_v46 = vpop.permute.xlu0 %293  ;;  %v2824_v61 = vadd.f32 %v2823_v60, %v299_v40 }
 0x663   :  { %v2815_v55 = vpack.c.bf16 %v2103_v50, %v2102_v51  ;;  %v2094_v56 = vadd.f32 %v2093_v54, %v3015_v49  ;;  %v2831_v49 = vadd.f32 %v294_v46, %v294_v46 }
 0x664   :  { %v2105_v57 = vmax.f32 %v2099_v53, 0.0  ;;  %v2825_v63 = vadd.f32 %v2824_v61, %v299_v40 }
 0x665   :  { %v2104_v59 = vmax.f32 %v2094_v56, 0.0  ;;  %2660 = vmatmul.mubr.msk.f32.vlgmr.msra.gmra.mrb[4].mxu0 %vm189_vm1, %v3025_v58  ;;  %2816 = vmatprep.subr.bf16.mxu0 %v2815_v55  ;;  %v2832_v62 = vadd.f32 %v2831_v49, %v294_v46 }
 0x666   :  { %2818 = vmatpush3.bf16.msra.mxu0 %v2815_v55  ;;  %2692 = vmatprep.mubr.msk.f32.mxu0 %vm189_vm1, %v3003_v38  ;;  %v2826_v3 = vadd.f32 %v2825_v63, %v299_v40 }
 0x667   :  { %v2819_v39 = vpack.c.bf16 %v2105_v57, %v2104_v59  ;;  %v2833_v0 = vadd.f32 %v2832_v62, %v294_v46 }
 0x668   :  { %v2827_v6 = vadd.f32 %v2826_v3, %v299_v40 }
 0x669   :  { %2820 = vmatprep.subr.bf16.mxu0 %v2819_v39  ;;  %v2834_v5 = vadd.f32 %v2833_v0, %v294_v46 }
 0x66a   :  { %2822 = vmatpush3.bf16.msra.mxu0 %v2819_v39  ;;  %v2828_v9 = vadd.f32 %v2827_v6, %v299_v40 }
 0x66b   :  { %v2835_v7 = vadd.f32 %v2834_v5, %v294_v46 }
 0x66c   :  { %v2829_v10 = vadd.f32 %v2828_v9, %v299_v40 }
 0x66d   :  { %2693 = vmatmul.mubr.msk.f32.vlgmr.msra.gmra.mrb[4].mxu0 %vm189_vm1, %v3025_v58  ;;  %v2836_v38 = vadd.f32 %v2835_v7, %v294_v46 }
 0x66f   :  { %v2837_v12 = vadd.f32 %v2836_v38, %v294_v46 }
 0x740   :  { %v2694_v11 = vpop.f32.mrb[4].mxu0 }
 0x741   :  { %v2830_v13 = vadd.f32 %v2829_v10, %v2694_v11  ;;  %v2172_v14 = vpop.f32.mrb[5].mxu0 }
 0x742   :  { %v2838_v58 = vadd.f32 %v2837_v12, %v2172_v14 }
 0x743   :  { %v2184_v15 = vmul.f32 0.125, %v2830_v13 }
 0x744   :  { %v2183_v20 = vmul.f32 0.125, %v2838_v58 }
 0x745   :  { %2187 = vst.msk [vmem:[%s3254_s7 + $0x8] sm:$0xff] %vm2185_vm2, %v2184_v15 }
 0x746   :  { %2186 = vst.msk [vmem:[%s3254_s7] sm:$0xff] %vm2185_vm2, %v2183_v20 }

</bundles_post_ra>
